<compile_context>
chip_gen: v7x
topology: tpu7x:2x2x1
jax: 0.10.0
libtpu: 0.0.40
codegen_flags: <defaults>
</compile_context>

<pallas_src>
import functools
import math

import jax
import jax.numpy as jnp
from jax.experimental import pallas as pl
from jax.experimental.pallas import tpu as pltpu

_LANE = 128
_SUBLANE = 8


def _round_up(x, m):
    return ((x + m - 1) // m) * m


def _vmem_capacity_bytes():
    """Physical VMEM per TensorCore (v5e/v6e: 128 MiB, v7x: 64 MiB)."""
    try:
        info = pltpu.get_tpu_info()
        cap = getattr(info, "vmem_capacity_bytes", None)
        if cap:
            return int(cap)
    except Exception:
        pass
    return 64 * 1024 * 1024  # conservative fallback (v7x per-TC)


# ----------------------------- VMEM estimates ------------------------------
_BF, _F = 2, 4  # bytes


def _single_pass_bytes(tb, s, c, dp):
    blocks = (2 * tb * s * c * _BF          # x block (double-buffered, bf16)
              + 2 * tb * s * _F             # log-mask block
              + 2 * tb * s * dp * _F)       # output block
    inter = (tb * s * 3 * dp * (_F + _BF)   # qkv f32 + bf16 q/k/v
             + 2 * tb * s * s * _F          # scores + probs (f32)
             + tb * s * dp * _F             # f32 output accumulator
             + 2 * tb * s * _F)             # m, l
    return blocks + inter


def _single_pass_fixed_bytes(c, dp):
    return 2 * (c * 3 * dp * _BF + 3 * dp * _F)   # double-buffered fused weights + bias


def _flash_bytes(tb, s, tk, c, dp):
    blocks = (2 * tb * s * c * _BF + 2 * tb * tk * c * _BF
              + 2 * tb * tk * _F + 2 * tb * s * dp * _F)
    scratch = tb * s * dp * _BF + 2 * tb * s * _F + tb * s * dp * _F
    inter = (tb * tk * 2 * dp * (_F + _BF) + 2 * tb * s * tk * _F + tb * s * dp * _F)
    return blocks + scratch + inter


def _flash_fixed_bytes(c, dp):
    return 2 * (c * dp * _BF + dp * _F + c * 2 * dp * _BF + 2 * dp * _F)


def _pick_tb(batches, per_batch_fn, fixed_bytes, budget):
    """Largest divisor of `batches` fitting the budget, keeping >= 2 grid steps when possible."""
    cap = batches if batches < 2 else max(1, batches // 2)
    best = 1
    for tb in range(1, cap + 1):
        if batches % tb:
            continue
        if fixed_bytes + per_batch_fn(tb) <= budget:
            best = tb
    return best


# -------------------------------- kernels ----------------------------------
def _attn_single_pass_kernel(x_ref, lm_ref, wqkv_ref, bqkv_ref, o_ref, *, d_pad):
    # x_ref: (TB, S, C) bf16    lm_ref: (TB, 1, S) f32 (= log(mask)/sqrt(C) per key)
    # wqkv_ref: (C, 3*Dp) bf16  bqkv_ref: (1, 3*Dp) f32   o_ref: (TB, S, Dp) f32
    dp = d_pad

    # Fused Q/K/V projection: one MXU pass over the shared weight.
    qkv = jnp.einsum('bsc,cn->bsn', x_ref[...], wqkv_ref[...],
                     preferred_element_type=jnp.float32)
    qkv = qkv + bqkv_ref[...]                                  # (TB, S, 3*Dp) f32

    q = qkv[:, :, :dp].astype(jnp.bfloat16)        # 1/sqrt(C) already folded into Wq/bq
    k = qkv[:, :, dp:2 * dp].astype(jnp.bfloat16)  # lane-aligned slices (Dp multiple of 128)
    v = qkv[:, :, 2 * dp:].astype(jnp.bfloat16)

    # scores[b,i,j] = q_scaled[b,i]·k[b,j] + log(mask[j,b])/sqrt(C)
    scores = jnp.einsum('bqd,bkd->bqk', q, k, preferred_element_type=jnp.float32)
    scores = scores + lm_ref[...]                              # broadcast over queries

    # Numerically stable softmax over keys (f32); normalization deferred to the output.
    m = jnp.max(scores, axis=-1, keepdims=True)
    p = jnp.exp(scores - m)
    l = jnp.sum(p, axis=-1, keepdims=True)                     # (TB, S, 1)

    out = jnp.einsum('bqk,bkd->bqd', p.astype(jnp.bfloat16), v,
                     preferred_element_type=jnp.float32)       # (TB, S, Dp)
    o_ref[...] = (out * pl.reciprocal(l, approx=True)).astype(o_ref.dtype)


def _attn_flash_kernel(xq_ref, xk_ref, lm_ref, wq_ref, bq_ref, wkv_ref, bkv_ref,
                       o_ref, q_sc, m_sc, l_sc, acc_sc, *, d_pad):
    # KV-tiled online-softmax. Grid = (batch tiles, key tiles); key axis is "arbitrary"/last.
    dp = d_pad
    kv = pl.program_id(1)

    @pl.when(kv == 0)
    def _():
        q = jnp.einsum('bsc,cd->bsd', xq_ref[...], wq_ref[...],
                       preferred_element_type=jnp.float32) + bq_ref[...]
        q_sc[...] = q.astype(jnp.bfloat16)
        # Finite "-inf" keeps the online softmax NaN-free when an entire key tile is masked.
        m_sc[...] = jnp.full_like(m_sc, -1e30)
        l_sc[...] = jnp.zeros_like(l_sc)
        acc_sc[...] = jnp.zeros_like(acc_sc)

    kvp = jnp.einsum('bkc,cn->bkn', xk_ref[...], wkv_ref[...],
                     preferred_element_type=jnp.float32) + bkv_ref[...]   # (TB, TK, 2*Dp)
    k = kvp[:, :, :dp].astype(jnp.bfloat16)
    v = kvp[:, :, dp:].astype(jnp.bfloat16)

    scores = jnp.einsum('bqd,bkd->bqk', q_sc[...], k,
                        preferred_element_type=jnp.float32)               # (TB, S, TK)
    scores = scores + lm_ref[...]

    m_new = jnp.maximum(m_sc[...], jnp.max(scores, axis=-1, keepdims=True))
    alpha = jnp.exp(m_sc[...] - m_new)
    p = jnp.exp(scores - m_new)
    l_sc[...] = alpha * l_sc[...] + jnp.sum(p, axis=-1, keepdims=True)
    acc_sc[...] = alpha * acc_sc[...] + jnp.einsum(
        'bqk,bkd->bqd', p.astype(jnp.bfloat16), v, preferred_element_type=jnp.float32)
    m_sc[...] = m_new

    @pl.when(kv == pl.num_programs(1) - 1)
    def _():
        o_ref[...] = (acc_sc[...] * pl.reciprocal(l_sc[...], approx=True)).astype(o_ref.dtype)


# ------------------------------- pallas_call --------------------------------
def _single_pass_call(x, lm, wq, bq, wk, bk, wv, bv, *, B, SP, C, DP, budget, vmem_limit):
    wqkv = jnp.concatenate([wq, wk, wv], axis=1).astype(jnp.bfloat16)   # (C, 3*Dp)
    bqkv = jnp.concatenate([bq, bk, bv], axis=1).astype(jnp.float32)    # (1, 3*Dp)
    TB = _pick_tb(B, lambda tb: _single_pass_bytes(tb, SP, C, DP),
                  _single_pass_fixed_bytes(C, DP), budget)
    kernel = functools.partial(_attn_single_pass_kernel, d_pad=DP)
    return pl.pallas_call(
        kernel,
        out_shape=jax.ShapeDtypeStruct((B, SP, DP), jnp.float32),
        grid=(B // TB,),
        in_specs=[
            pl.BlockSpec((TB, SP, C), lambda b: (b, 0, 0)),     # x (bf16)
            pl.BlockSpec((TB, 1, SP), lambda b: (b, 0, 0)),     # log(mask)/sqrt(C)
            pl.BlockSpec((C, 3 * DP), lambda b: (0, 0)),        # fused W_qkv
            pl.BlockSpec((1, 3 * DP), lambda b: (0, 0)),        # fused b_qkv
        ],
        out_specs=pl.BlockSpec((TB, SP, DP), lambda b: (b, 0, 0)),
        compiler_params=pltpu.CompilerParams(
            dimension_semantics=("parallel",),
            vmem_limit_bytes=vmem_limit,
        ),
    )(x, lm, wqkv, bqkv)


def _flash_call(x, lm, wq, bq, wk, bk, wv, bv, *, B, SP, C, DP, TK, budget, vmem_limit):
    wq_b = wq.astype(jnp.bfloat16)                                      # (C, Dp)
    bq_f = bq.astype(jnp.float32)                                       # (1, Dp)
    wkv = jnp.concatenate([wk, wv], axis=1).astype(jnp.bfloat16)        # (C, 2*Dp)
    bkv = jnp.concatenate([bk, bv], axis=1).astype(jnp.float32)         # (1, 2*Dp)
    TB = _pick_tb(B, lambda tb: _flash_bytes(tb, SP, TK, C, DP),
                  _flash_fixed_bytes(C, DP), budget)
    kernel = functools.partial(_attn_flash_kernel, d_pad=DP)
    return pl.pallas_call(
        kernel,
        out_shape=jax.ShapeDtypeStruct((B, SP, DP), jnp.float32),
        grid=(B // TB, SP // TK),
        in_specs=[
            pl.BlockSpec((TB, SP, C), lambda b, kv: (b, 0, 0)),     # x for queries (fetched once per b)
            pl.BlockSpec((TB, TK, C), lambda b, kv: (b, kv, 0)),    # x for this key tile
            pl.BlockSpec((TB, 1, TK), lambda b, kv: (b, 0, kv)),    # log-mask for this key tile
            pl.BlockSpec((C, DP), lambda b, kv: (0, 0)),            # W_q (scale folded)
            pl.BlockSpec((1, DP), lambda b, kv: (0, 0)),            # b_q (scale folded)
            pl.BlockSpec((C, 2 * DP), lambda b, kv: (0, 0)),        # fused W_kv
            pl.BlockSpec((1, 2 * DP), lambda b, kv: (0, 0)),        # fused b_kv
        ],
        out_specs=pl.BlockSpec((TB, SP, DP), lambda b, kv: (b, 0, 0)),
        scratch_shapes=[
            pltpu.VMEM((TB, SP, DP), jnp.bfloat16),   # q
            pltpu.VMEM((TB, SP, 1), jnp.float32),     # m
            pltpu.VMEM((TB, SP, 1), jnp.float32),     # l
            pltpu.VMEM((TB, SP, DP), jnp.float32),    # acc
        ],
        compiler_params=pltpu.CompilerParams(
            dimension_semantics=("parallel", "arbitrary"),
            vmem_limit_bytes=vmem_limit,
        ),
    )(x, x, lm, wq_b, bq_f, wkv, bkv)


# --------------------------------- wrapper ----------------------------------
def self_attention(x_sbd, mask_sb, params, heads, *, flash_kv_block=None):
    """x_sbd: (S, B, C), mask_sb: (S, B).  Returns (S, B, C // heads)."""
    S, B, C = x_sbd.shape
    D = C // heads
    wq, bq, wk, bk, wv, bv = params
    scale = 1.0 / math.sqrt(C)

    DP = _round_up(D, _LANE)      # lane-dense output / lane-aligned q,k,v slices
    SP = _round_up(S, _SUBLANE)   # sublane-aligned tiles

    def pad_wb(w, b):             # zero-pad feature columns D -> Dp
        return (jnp.pad(w, ((0, 0), (0, DP - D))),
                jnp.pad(b, ((0, 0), (0, DP - D))))

    wq_p, bq_p = pad_wb(wq * scale, bq * scale)   # fold 1/sqrt(C) into Q
    wk_p, bk_p = pad_wb(wk, bk)
    wv_p, bv_p = pad_wb(wv, bv)

    # Batch-major inputs; matmul operands in bf16 (halves x DMA, bf16 MXU path).
    x = jnp.transpose(x_sbd, (1, 0, 2)).astype(jnp.bfloat16)            # (B, S, C)
    if SP != S:
        x = jnp.pad(x, ((0, 0), (0, SP - S), (0, 0)))
    lm = jnp.log(mask_sb.astype(jnp.float32)) * scale                   # (S, B), per KEY pos
    lm = jnp.transpose(lm, (1, 0))                                      # (B, S)
    if SP != S:
        lm = jnp.pad(lm, ((0, 0), (0, SP - S)), constant_values=-jnp.inf)
    lm = lm.reshape(B, 1, SP)

    # Generation-aware VMEM budgeting (v5e/v6e: 128 MiB physical, v7x: 64 MiB).
    vmem_cap = _vmem_capacity_bytes()
    budget = vmem_cap // 4                                   # per-step working set
    vmem_limit = min((vmem_cap * 3) // 4, 96 * 1024 * 1024)  # scoped VMEM limit with headroom

    # Switch to the KV-tiled flash path once the (S,S) scores dominate the budget.
    if (flash_kv_block is None and SP % _LANE == 0 and
            _single_pass_fixed_bytes(C, DP) + _single_pass_bytes(1, SP, C, DP) > budget):
        flash_kv_block = _LANE

    if flash_kv_block is not None:
        TK = int(flash_kv_block)
        if SP % TK != 0 or not (TK % _LANE == 0 or TK == SP):
            raise ValueError(f"flash_kv_block={TK} must divide padded seq {SP} "
                             f"and be a multiple of {_LANE}")
        out = _flash_call(x, lm, wq_p, bq_p, wk_p, bk_p, wv_p, bv_p,
                          B=B, SP=SP, C=C, DP=DP, TK=TK,
                          budget=budget, vmem_limit=vmem_limit)
    else:
        out = _single_pass_call(x, lm, wq_p, bq_p, wk_p, bk_p, wv_p, bv_p,
                                B=B, SP=SP, C=C, DP=DP,
                                budget=budget, vmem_limit=vmem_limit)

    out = jnp.transpose(out, (1, 0, 2))                                 # (SP, B, Dp)
    return out[:S, :, :D]                                               # strip padding


# -------------------------------- reference ---------------------------------
def self_attention_reference(x_sbd, mask_sb, params):
    """Pure-JAX f32 reference mirroring the PyTorch forward pass exactly."""
    wq, bq, wk, bk, wv, bv = params
    S, B, C = x_sbd.shape
    q = jnp.einsum('sbc,cd->sbd', x_sbd, wq) + bq[0]
    k = jnp.einsum('sbc,cd->sbd', x_sbd, wk) + bk[0]
    v = jnp.einsum('sbc,cd->sbd', x_sbd, wv) + bv[0]
    qb = jnp.transpose(q, (1, 0, 2))
    kb = jnp.transpose(k, (1, 0, 2))
    vb = jnp.transpose(v, (1, 0, 2))
    scores = jnp.einsum('bid,bjd->bij', qb, kb)
    scores = scores + jnp.log(jnp.transpose(mask_sb, (1, 0)))[:, None, :]
    scores = scores / math.sqrt(C)
    p = jax.nn.softmax(scores, axis=-1)
    out = jnp.einsum('bij,bjd->bid', p, vb)
    return jnp.transpose(out, (1, 0, 2))                                # (S, B, D)


if __name__ == "__main__":
    def make_params(key, C, D):
        ks = jax.random.split(key, 6)
        bound = 1.0 / math.sqrt(C)   # mimic nn.Linear default init range
        return (jax.random.uniform(ks[0], (C, D), jnp.float32, -bound, bound),
                jax.random.uniform(ks[1], (1, D), jnp.float32, -bound, bound),
                jax.random.uniform(ks[2], (C, D), jnp.float32, -bound, bound),
                jax.random.uniform(ks[3], (1, D), jnp.float32, -bound, bound),
                jax.random.uniform(ks[4], (C, D), jnp.float32, -bound, bound),
                jax.random.uniform(ks[5], (1, D), jnp.float32, -bound, bound))

    key = jax.random.PRNGKey(0)

    # --- Test 1: small shapes, single-pass path (matches the module's typical use). ---
    S, B, C, heads = 8, 2, 32, 4
    k0, k1, key = jax.random.split(key, 3)
    params = make_params(k0, C, C // heads)
    x = jax.random.normal(k1, (S, B, C), jnp.float32)                   # (seq, batch, dim)
    mask = jnp.ones((S, B), jnp.float32).at[0, 0].set(0.0).at[3, 1].set(0.0)
    out = jax.block_until_ready(self_attention(x, mask, params, heads))
    ref = self_attention_reference(x, mask, params)
    assert out.shape == (S, B, C // heads), out.shape
    assert jnp.allclose(out, ref, atol=2e-2, rtol=2e-2), float(jnp.max(jnp.abs(out - ref)))

    # --- Test 2: larger seq exercising the KV-tiled online-softmax (flash) path. ---
    S, B, C, heads = 256, 2, 128, 16
    k0, k1, key = jax.random.split(key, 3)
    params = make_params(k0, C, C // heads)
    x = jax.random.normal(k1, (S, B, C), jnp.float32)
    mask = jnp.ones((S, B), jnp.float32)
    mask = mask.at[::17, 0].set(0.0).at[5::31, 1].set(0.0)              # scattered masked keys
    out = jax.block_until_ready(self_attention(x, mask, params, heads, flash_kv_block=128))
    ref = self_attention_reference(x, mask, params)
    assert out.shape == (S, B, C // heads), out.shape
    assert jnp.allclose(out, ref, atol=2e-2, rtol=2e-2), float(jnp.max(jnp.abs(out - ref)))

    print("KERNEL_OK")
</pallas_src>

<mosaic_0001>
module attributes {stable_mosaic.version = 11 : i64} {
  func.func @_attn_single_pass_kernel(%arg0: i32, %arg1: memref<1x8x32xbf16, #tpu.memory_space<vmem>>, %arg2: memref<1x1x8xf32, #tpu.memory_space<vmem>>, %arg3: memref<32x384xbf16, #tpu.memory_space<vmem>>, %arg4: memref<1x384xf32, #tpu.memory_space<vmem>>, %arg5: memref<1x8x128xf32, #tpu.memory_space<vmem>>) attributes {dimension_semantics = [#tpu.dimension_semantics<parallel>], iteration_bounds = array<i64: 2>, scalar_prefetch = 0 : i64, scratch_operands = 0 : i64, tpu.core_type = #tpu.core_type<tc>, window_params = [{transform_indices = @transform_0, window_bounds = array<i64: 1, 8, 32>}, {transform_indices = @transform_1, window_bounds = array<i64: 1, 1, 8>}, {pipeline_mode = #tpu.pipeline_mode<synchronous>, transform_indices = @transform_2, window_bounds = array<i64: 32, 384>}, {pipeline_mode = #tpu.pipeline_mode<synchronous>, transform_indices = @transform_3, window_bounds = array<i64: 1, 384>}, {transform_indices = @transform_4, window_bounds = array<i64: 1, 8, 128>}]} {
    %c0 = arith.constant 0 : index
    %c0_0 = arith.constant 0 : index
    %c0_1 = arith.constant 0 : index
    %0 = vector.load %arg1[%c0, %c0_0, %c0_1] : memref<1x8x32xbf16, #tpu.memory_space<vmem>>, vector<1x8x32xbf16>
    %c0_2 = arith.constant 0 : index
    %c0_3 = arith.constant 0 : index
    %1 = vector.load %arg3[%c0_2, %c0_3] : memref<32x384xbf16, #tpu.memory_space<vmem>>, vector<32x384xbf16>
    "tpu.trace_start"() <{level = 10 : i32, message = "bsc,cn->bsn"}> : () -> ()
    %cst = arith.constant dense<0.000000e+00> : vector<1x8x384xf32>
    %2 = tpu.matmul %0, %1, %cst {dimension_numbers = #tpu.dot_dimension_numbers<[2], [0], [0, 1], [1], [0, 0, 0, 1, 1, 1], [], []>} : vector<1x8x32xbf16>, vector<32x384xbf16>, vector<1x8x384xf32> -> vector<1x8x384xf32>
    "tpu.trace_stop"() : () -> ()
    %c0_4 = arith.constant 0 : index
    %c0_5 = arith.constant 0 : index
    %3 = vector.load %arg4[%c0_4, %c0_5] : memref<1x384xf32, #tpu.memory_space<vmem>>, vector<1x384xf32>
    %4 = vector.shape_cast %3 : vector<1x384xf32> to vector<1x1x384xf32>
    %5 = vector.broadcast %4 : vector<1x1x384xf32> to vector<1x8x384xf32>
    %6 = arith.addf %2, %5 : vector<1x8x384xf32>
    %7 = vector.extract_strided_slice %6 {offsets = [0, 0, 0], sizes = [1, 8, 128], strides = [1, 1, 1]} : vector<1x8x384xf32> to vector<1x8x128xf32>
    %8 = arith.truncf %7 : vector<1x8x128xf32> to vector<1x8x128xbf16>
    %9 = vector.extract_strided_slice %6 {offsets = [0, 0, 128], sizes = [1, 8, 128], strides = [1, 1, 1]} : vector<1x8x384xf32> to vector<1x8x128xf32>
    %10 = arith.truncf %9 : vector<1x8x128xf32> to vector<1x8x128xbf16>
    %11 = vector.extract_strided_slice %6 {offsets = [0, 0, 256], sizes = [1, 8, 128], strides = [1, 1, 1]} : vector<1x8x384xf32> to vector<1x8x128xf32>
    %12 = arith.truncf %11 : vector<1x8x128xf32> to vector<1x8x128xbf16>
    "tpu.trace_start"() <{level = 10 : i32, message = "bqd,bkd->bqk"}> : () -> ()
    %cst_6 = arith.constant dense<0.000000e+00> : vector<1x8x8xf32>
    %13 = tpu.matmul %8, %10, %cst_6 {dimension_numbers = #tpu.dot_dimension_numbers<[2], [2], [1], [1], [0, 0, 0, 1, 1, 1], [0], [0]>} : vector<1x8x128xbf16>, vector<1x8x128xbf16>, vector<1x8x8xf32> -> vector<1x8x8xf32>
    "tpu.trace_stop"() : () -> ()
    %c0_7 = arith.constant 0 : index
    %c0_8 = arith.constant 0 : index
    %c0_9 = arith.constant 0 : index
    %14 = vector.load %arg2[%c0_7, %c0_8, %c0_9] : memref<1x1x8xf32, #tpu.memory_space<vmem>>, vector<1x1x8xf32>
    %15 = vector.broadcast %14 : vector<1x1x8xf32> to vector<1x8x8xf32>
    %16 = arith.addf %13, %15 : vector<1x8x8xf32>
    %cst_10 = arith.constant dense<0xFF800000> : vector<1x8xf32>
    %17 = vector.multi_reduction <maximumf>, %16, %cst_10 [2] : vector<1x8x8xf32> to vector<1x8xf32>
    %18 = vector.shape_cast %17 : vector<1x8xf32> to vector<1x8x1xf32>
    %19 = vector.broadcast %18 : vector<1x8x1xf32> to vector<1x8x8xf32>
    %20 = arith.subf %16, %19 : vector<1x8x8xf32>
    %21 = math.exp %20 : vector<1x8x8xf32>
    %cst_11 = arith.constant dense<0.000000e+00> : vector<1x8xf32>
    %22 = vector.multi_reduction <add>, %21, %cst_11 [2] : vector<1x8x8xf32> to vector<1x8xf32>
    %23 = vector.shape_cast %22 : vector<1x8xf32> to vector<1x8x1xf32>
    %24 = arith.truncf %21 : vector<1x8x8xf32> to vector<1x8x8xbf16>
    "tpu.trace_start"() <{level = 10 : i32, message = "bqk,bkd->bqd"}> : () -> ()
    %cst_12 = arith.constant dense<0.000000e+00> : vector<1x8x128xf32>
    %25 = tpu.matmul %24, %12, %cst_12 {dimension_numbers = #tpu.dot_dimension_numbers<[2], [1], [1], [2], [0, 0, 0, 1, 1, 2], [0], [0]>} : vector<1x8x8xbf16>, vector<1x8x128xbf16>, vector<1x8x128xf32> -> vector<1x8x128xf32>
    "tpu.trace_stop"() : () -> ()
    %26 = tpu.reciprocal %23 {approx = true} : vector<1x8x1xf32> -> vector<1x8x1xf32>
    %27 = vector.broadcast %26 : vector<1x8x1xf32> to vector<1x8x128xf32>
    %28 = arith.mulf %25, %27 : vector<1x8x128xf32>
    %c0_13 = arith.constant 0 : index
    %c0_14 = arith.constant 0 : index
    %c0_15 = arith.constant 0 : index
    %29 = vector.load %arg5[%c0_13, %c0_14, %c0_15] : memref<1x8x128xf32, #tpu.memory_space<vmem>>, vector<1x8x128xf32>
    tpu.vector_store %arg5[%c0_13, %c0_14, %c0_15], %28 {strides = array<i32>} : memref<1x8x128xf32, #tpu.memory_space<vmem>>, vector<1x8x128xf32>,
    return
  }
  func.func @transform_0(%arg0: i32) -> (i32, i32, i32) {
    %c0_i32 = arith.constant 0 : i32
    %c0_i32_0 = arith.constant 0 : i32
    %c0_i32_1 = arith.constant 0 : i32
    return %arg0, %c0_i32, %c0_i32_0 : i32, i32, i32
  }
  func.func @transform_1(%arg0: i32) -> (i32, i32, i32) {
    %c0_i32 = arith.constant 0 : i32
    %c0_i32_0 = arith.constant 0 : i32
    %c0_i32_1 = arith.constant 0 : i32
    return %arg0, %c0_i32, %c0_i32_0 : i32, i32, i32
  }
  func.func @transform_2(%arg0: i32) -> (i32, i32) {
    %c0_i32 = arith.constant 0 : i32
    %c0_i32_0 = arith.constant 0 : i32
    %c0_i32_1 = arith.constant 0 : i32
    return %c0_i32, %c0_i32_0 : i32, i32
  }
  func.func @transform_3(%arg0: i32) -> (i32, i32) {
    %c0_i32 = arith.constant 0 : i32
    %c0_i32_0 = arith.constant 0 : i32
    %c0_i32_1 = arith.constant 0 : i32
    return %c0_i32, %c0_i32_0 : i32, i32
  }
  func.func @transform_4(%arg0: i32) -> (i32, i32, i32) {
    %c0_i32 = arith.constant 0 : i32
    %c0_i32_0 = arith.constant 0 : i32
    %c0_i32_1 = arith.constant 0 : i32
    return %arg0, %c0_i32, %c0_i32_0 : i32, i32, i32
  }
}

</mosaic_0001>

<bundles_post_ra>
// kernel: tpu_custom_call.1
= control target key start
LH: loop header
LB: loop body
LE: loop exit
PB: predicated region body
PF: predicated region fallthrough
CT: control target
= control target key end

     0   :  { %9 = vsyncpa [#allocation3], 0  ;;  %s1096_s0 = inlined_call_operand.hbm [shape: bf16[2,8,32], index: 0, kind: input, shape index: {}]   ;;  %s1097_s1 = inlined_call_operand.vmem [shape: f32[2,1,8], index: 1, kind: input, shape index: {}]   ;;  %s1098_s2 = inlined_call_operand.hbm [shape: bf16[32,384], index: 2, kind: input, shape index: {}]   ;;  %s1099_s3 = inlined_call_operand.vmem [shape: f32[1,384], index: 3, kind: input, shape index: {}]   ;;  %s1100_s4 = inlined_call_operand.hbm [shape: f32[2,8,128], index: 4, kind: output, shape index: {}]  }
   0x1   :  { %11 = vsyncpa [#allocation3 + $0x1], 0 }
   0x2   :  { %12 = vsyncpa [#allocation6], 0 }
   0x3   :  { %13 = vsyncpa [#allocation4], 0 }
   0x4   :  { %15 = vsyncpa [#allocation4 + $0x1], 0  ;;  %s888_s15 = smov 0   ;;  %s890_s16 = smov 0  }
   0x5   :  { %s892_s17 = smov 0   ;;  %s894_s18 = smov 0  }
   0x6 LB: > { %s909_s19 = sadd.s32 4294967295, %s853_s18   ;;  %s600_s20 = sadd.s32 4294967294, %s853_s18   ;;  %s853_s18 = sphi %s894_s18, %s1120_s18   ;;  %s849_s17 = sphi %s892_s17, %s1119_s17   ;;  %s845_s16 = sphi %s890_s16, %s1118_s16   ;;  %s841_s15 = sphi %s888_s15, %s1117_s15  }
   0x7   : > { %p41_p0 = scmp.ne.s32.totalorder %s845_s16, %s841_s15  ;;  %p1101_p1 = scmp.eq.s32.totalorder %s909_s19, 0 }
   0x8   : > { %p139_p3 = scmp.eq.s32.totalorder %s600_s20, 1  ;;  %p601_p5 = scmp.ge.s32.totalorder %s853_s18, 1 }
   0x9   : > { %p918_p4 = por %p1101_p1, %p41_p0  ;;  %p146_p7 = scmp.lt.s32.totalorder %s853_s18, 3 }
   0xa   : > { %p923_p6 = por %p139_p3, %p41_p0  ;;  %s855_s24 = smov [#allocation5]  }
   0xb   : > { %s1104_s21 = scalar_select %p918_p4, 1, 0 }
   0xc   : > { %s1105_s22 = scalar_select %p923_p6, 1, 0 }
   0xd   : > { %p928_p8 = pnand %p601_p5, %p146_p7  ;;  %s158_s25 = sshll.u32 %s855_s24, 4  ;;  %s932_s25 = int_to_ptr.vmem [resolvable:$true] %s158_s25 }
   0xe   : > { %s944_s27 = sadd.s32 1, %s853_s18   ;;  %s28_s28 = sadd.s32 1, %s849_s17 }
   0xf   : > { %s1106_s23 = scalar_select %p928_p8, 1, 0 }
  0x10   : > { %p659_p9 = pneg %p928_p8  ;;  %s25_s29 = ssub.s32 %s853_s18, %s944_s27 }
  0x11   : > { %s725_s6 = scalar_lea.hbm %s1098_s2, 768 }
  0x12   : > { %p939_p11 = pnand %p659_p9, %p1101_p1  ;;  %p726_p12 = scmp.ne.s32.totalorder %s1098_s2, %s725_s6 }
  0x13   : > { %p732_p5 = scmp.lt.u32.totalorder %s725_s6, %s1098_s2 }
  0x14   : > { %p727_p13 = pneg %p939_p11 }
  0x16   : > { %p728_p0 = pnand %p727_p13, %p726_p12 }
  0x18   : > { %p729_p3 = pneg %p728_p0 }
  0x1a   : > { %p734_p7 = pnand %p732_p5, %p729_p3 }
  0x1c   : > { %737 = shalt.err (!%p734_p7)
}
  0x1d   : > { %s738_s11 = scalar_lea.vmem %s932_s25, 768  ;;  %p746_p2 = scmp.lt.s32.totalorder %s932_s25, %s932_s25 }
  0x1e   : > { %p739_p9 = scmp.ne.s32.totalorder %s932_s25, %s738_s11  ;;  %p747_p6 = scmp.lt.s32.totalorder %s738_s11, %s738_s11 }
  0x20   : > { %p741_p10 = pnand %p739_p9, %p727_p13  ;;  %p748_p4 = por %p747_p6, %p746_p2 }
  0x22   : > { %p742_p1 = pneg %p741_p10 }
  0x24   : > { %p749_p8 = pnand %p748_p4, %p742_p1 }
  0x26   : > { %752 = shalt.err (!%p749_p8)
}
  0x27   : > { %s856_s12 = smov 192   ;;  %s857_s13 = smov 12  }
  0x28   : > { %662 = dma.hbm_to_vmem [thread:$0]  (!%p939_p11), %s1098_s2, 768, %s932_s25, [#allocation6], %s856_s12, %s856_s12, %s857_s13  }
  0x29   : > { %p26_p2 = scmp.eq.s32.totalorder %s25_s29, 0  ;;  %p35_p1 = scmp.ne.s32.totalorder %s849_s17, %s845_s16 }
  0x2a   : > { %p36_p4 = scmp.eq.s32.totalorder %s853_s18, 0  ;;  %p672_p6 = scmp.lt.s32.totalorder %s853_s18, 2 }
  0x2b   : > { %s975_s24 = scalar_select %p26_p2, %s849_s17, %s28_s28  }
  0x2c   : > { %p37_p8 = por %p36_p4, %p35_p1  ;;  %p1108_p10 = scmp.eq.s32.totalorder %s909_s19, 1 }
  0x2d   : > { %s175_s5 = sand.u32 1, %s849_s17   ;;  %s605_s6 = sshll.u32 %s853_s18, 6 }
  0x2e   : > { %p979_p12 = por %p1108_p10, %p35_p1  ;;  %s604_s7 = sshll.u32 %s175_s5, 2 }
  0x2f   : > { %s988_s9 = scalar_lea.hbm %s1096_s0, %s605_s6  ;;  %s179_s25 = scalar_lea.vmem [#allocation2], %s604_s7 }
  0x30   : > { %s186_s28 = sshll.u32 %s179_s25, 4  ;;  %p990_p11 = pnand %p672_p6, %p37_p8  ;;  %s994_s28 = int_to_ptr.vmem [resolvable:$true] %s186_s28 }
  0x31   : > { %s176_s10 = scalar_lea.sflag [#allocation3], %s175_s5  ;;  %s753_s11 = scalar_lea.hbm %s988_s9, 64 }
  0x32   : > { %p754_p13 = scmp.ne.s32.totalorder %s988_s9, %s753_s11  ;;  %p755_p0 = pneg %p990_p11 }
  0x33   : > { %s758_s14 = scalar_lea.hbm %s1096_s0, 128  ;;  %p759_p7 = scmp.lt.u32.totalorder %s988_s9, %s1096_s0 }
  0x34   : > { %p756_p3 = pnand %p755_p0, %p754_p13  ;;  %p760_p9 = scmp.lt.u32.totalorder %s758_s14, %s753_s11 }
  0x35   : > { %p762_p1 = scmp.lt.u32.totalorder %s753_s11, %s988_s9 }
  0x36   : > { %p757_p5 = pneg %p756_p3  ;;  %p761_p2 = por %p760_p9, %p759_p7 }
  0x38   : > { %p763_p4 = por %p762_p1, %p761_p2 }
  0x3a   : > { %p764_p6 = pnand %p763_p4, %p757_p5 }
  0x3c   : > { %767 = shalt.err (!%p764_p6)
}
  0x3d   : > { %s768_s5 = scalar_lea.vmem %s994_s28, 64  ;;  %s858_s7 = smov [#allocation2]  }
  0x3e   : > { %p769_p8 = scmp.ne.s32.totalorder %s994_s28, %s768_s5  ;;  %s773_s26 = sshll.u32 %s858_s7, 4  ;;  %s774_s26 = int_to_ptr.vmem [resolvable:$false] %s773_s26 }
  0x3f   : > { %s775_s8 = scalar_lea.vmem %s774_s26, 128  ;;  %p776_p3 = scmp.lt.s32.totalorder %s994_s28, %s774_s26 }
  0x40   : > { %p771_p10 = pnand %p769_p8, %p755_p0  ;;  %p777_p7 = scmp.lt.s32.totalorder %s775_s8, %s768_s5 }
  0x42   : > { %p772_p13 = pneg %p771_p10  ;;  %p778_p9 = por %p777_p7, %p776_p3 }
  0x44   : > { %p779_p2 = pnand %p778_p9, %p772_p13 }
  0x46   : > { %782 = shalt.err (!%p779_p2)
}
  0x47   : > { %666 = dma.hbm_to_vmem [thread:$0]  (!%p990_p11), %s988_s9, 64, %s994_s28, %s176_s10  }
  0x48   : > { %p1111_p5 = scmp.ne.s32.totalorder %s1106_s23, 0 }
  0x49   : > { %s1024_s25 = sand.u32 (!%p1111_p5), 1, %s845_s16   ;;  %p1112_p0 = scmp.ne.s32.totalorder (!%p1111_p5), %s1104_s21, 0 }
  0x4a   : > { %201 = sbr.rel (%p1111_p5) target bundleno = 920 (0x398), region = 36  ;;  %s607_s11 = sshll.u32 (!%p1111_p5), %s1024_s25, 2 }
  0x4b   : > { %s204_s12 = scalar_lea.sflag (!%p1111_p5), [#allocation3], %s1024_s25  ;;  %s207_s13 = scalar_lea.vmem (!%p1111_p5), [#allocation2], %s607_s11 }
  0x51   : > { %828 = dma.done.wait (%p1112_p0), %s204_s12, 64  }
  0x52   : > { %830 = vsyncadd (%p1112_p0), %s204_s12, 4294967232  ;;  %p1113_p1 = scmp.eq.s32.totalorder %s909_s19, 0 }
  0x54   : > { %832 = dma.done.wait (%p1113_p1), [#allocation6], 768   ;;  %p1114_p11 = pmov %p1113_p1 }
  0x55   : > { %v859_v0 = vmov 0   ;;  %v713_v1 = vld [vmem:[#allocation5 + $0x4] ss:$12 sps:$4 sm:$0xff]   ;;  %v715_v2 = vld [vmem:[#allocation5] ss:$12 sps:$4 sm:$0xff]   ;;  %vm301_vm0 = vcmask 261120   ;;  %v254_v9 = vlaneseq }
  0x56   : > { %834 = vsyncadd (%p1114_p11), [#allocation6], 4294966528  ;;  %337 = vmatprep.mubr.bf16.mxu0 %v859_v0  ;;  %305 = vmatprep.subr.bf16.mxu0 %v713_v1  ;;  %v716_v3 = vld [vmem:[#allocation5 + $0x1c] ss:$12 sps:$4 sm:$0xff]   ;;  %v718_v4 = vld [vmem:[#allocation5 + $0x18] ss:$12 sps:$4 sm:$0xff]  }
  0x57   : > { %306 = vmatpush1.bf16.msra.mxu0 %v715_v2  ;;  %v243_v5 = vld [vmem:[%s207_s13] sm:$0xf]  ;;  %v860_v6 = vmov 0.0   ;;  %vm861_vm1 = vmmov 0   ;;  %v719_v7 = vld [vmem:[#allocation5 + $0x8] ss:$12 sps:$4 sm:$0xff]  }
  0x58   : > { %307 = vmatprep.subr.bf16.mxu0 %v716_v3  ;;  %631 = vmatprep.subr.bf16.mxu1 %v860_v6  ;;  %v720_v8 = vld [vmem:[#allocation5 + $0x20] ss:$12 sps:$4 sm:$0xff]   ;;  %v255_v10 = vshrl.u32 %v254_v9, 7  ;;  %v252_v12 = vld [vmem:[%s1099_s3] sm:$0x7]  ;;  %p239_p4 = scmp.lt.s32.totalorder %s909_s19, 1 }
  0x59   : > { %635 = vmatprep.mubr.msk.bf16.mxu1 %vm861_vm1, %v860_v6  ;;  %632 = vmatpush3.bf16.msra.mxu1 %v719_v7  ;;  %vm436_vm2 = vcmask 64512   ;;  %vm450_vm3 = vcmask 1043456   ;;  %s609_s14 = sshll.u32 %s1024_s25, 3  ;;  %s621_s20 = sshll.u32 %s909_s19, 7 }
  0x5a   : > { %633 = vmatprep.subr.bf16.mxu1 %v860_v6  ;;  %v260_v11 = vsub.s32 1, %v255_v10  ;;  %v256_v14 = vsub.s32 0, %v255_v10  ;;  %s240_s9 = scalar_select %p239_p4, %s909_s19, 1  ;;  %v264_v31 = vsub.s32 2, %v255_v10 }
  0x5b   : > { %308 = vmatpush1.bf16.msra.mxu0 %v718_v4  ;;  %s238_s6 = scalar_lea.vmem [#allocation7], %s609_s14  ;;  %s1052_s8 = scalar_lea.hbm %s1100_s4, %s621_s20 }
  0x5c   : > { %639 = vmatprep.subr.bf16.mxu0 %v860_v6  ;;  %v261_v13 = vrot.slane %v252_v12, %v260_v11  ;;  %v257_v19 = vrot.slane %v252_v12, %v256_v14  ;;  %s241_s10 = scalar_lea.vmem %s1097_s1, %s240_s9  ;;  %v265_v34 = vrot.slane %v252_v12, %v264_v31  ;;  %s511_s5 = sshll.u32 %s238_s6, 4  ;;  %s1054_s5 = int_to_ptr.vmem [resolvable:$true] %s511_s5 }
  0x5d   : > { %634 = vmatpush3.bf16.msra.mxu1 %v720_v8  ;;  %v618_v24 = vld [vmem:[%s241_s10] ss:$0 sm:$0xff]  ;;  %s498_s19 = scalar_lea.sflag [#allocation4], %s1024_s25  ;;  %s783_s11 = scalar_lea.vmem %s1054_s5, 128 }
  0x5e   : > { %616 = vmatmul.mubr.msk.bf16.vlgmr.msra.gmra.mrb[0].mxu0 %vm301_vm0, %v243_v5  ;;  %645 = vmatprep.subr.bf16.mxu1 %v860_v6  ;;  %p784_p6 = scmp.ne.s32.totalorder %s1054_s5, %s783_s11  ;;  %s862_s12 = smov [#allocation7]  }
  0x5f   : > { %641 = vmatprep.mubr.msk.bf16.mxu0 %vm861_vm1, %v860_v6  ;;  %s787_s13 = sshll.u32 %s862_s12, 4  ;;  %s788_s13 = int_to_ptr.vmem [resolvable:$false] %s787_s13 }
  0x60   : > { %636 = vmatmul.mubr.msk.bf16.vlgmr.msra.gmra.mrb[0].mxu1 %vm301_vm0, %v243_v5  ;;  %p785_p8 = pnand %p784_p6, %p979_p12  ;;  %s789_s21 = scalar_lea.vmem %s788_s13, 256 }
  0x61   : > { %647 = vmatprep.mubr.msk.bf16.mxu1 %vm861_vm1, %v860_v6  ;;  %p790_p13 = scmp.lt.s32.totalorder %s1054_s5, %s788_s13  ;;  %p791_p3 = scmp.lt.s32.totalorder %s789_s21, %s783_s11 }
  0x62   : > { %p786_p10 = pneg %p785_p8 }
  0x63   : > { %p792_p7 = por %p791_p3, %p790_p13 }
  0x65   : > { %p793_p9 = pnand %p792_p7, %p786_p10 }
 0x131   : > { %v339_v15 = vpop.f32.mrb[0].mxu0 }
 0x132   : > { %v341_v16 = vpop.f32.mrb[1].mxu0  ;;  %v340_v22 = vadd.f32 %v339_v15, %v257_v19 }
 0x133   : > { %v342_v17 = vadd.f32 %v341_v16, %v261_v13  ;;  %v343_v18 = vpop.f32.mrb[2].mxu0  ;;  %v380_v32 = vpop.f32.mrb[0].mxu1 }
 0x134   : > { %v344_v20 = vpop.f32.mrb[3].mxu0  ;;  %v386_v23 = vpack.c.bf16 %v340_v22, %v340_v22  ;;  %v637_v33 = vpop.f32.mrb[1].mxu1  ;;  %v381_v37 = vadd.f32 %v380_v32, %v265_v34 }
 0x135   : > { %v387_v21 = vpack.c.bf16 %v342_v17, %v342_v17  ;;  %v383_v35 = vpop.f32.mrb[2].mxu1 }
 0x136   : > { %v638_v36 = vpop.f32.mrb[3].mxu1  ;;  %v388_v38 = vpack.c.bf16 %v381_v37, %v381_v37 }
 0x137   : > { %640 = vmatpush3.bf16.xpose.msra.mxu0 %v387_v21 }
 0x138   : > { %v452_v39 = vsel %vm450_vm3, %v388_v38, 0 }
 0x139   : > { %646 = vmatpush3.bf16.msra.mxu1 %v452_v39 }
 0x13e   : > { %642 = vmatmul.mubr.bf16.vlgmr.msra.gmra.mrb[4].mxu0 %v386_v23 }
 0x211   : > { %v430_v25 = vpop.f32.mrb[4].mxu0 }
 0x212   : > { %v431_v26 = vadd.f32 %v618_v24, %v430_v25  ;;  %v643_v27 = vpop.f32.mrb[5].mxu0 }
 0x213   : > { %v433_v28 = vpop.f32.mrb[6].mxu0 }
 0x214   : > { %v644_v29 = vpop.f32.mrb[7].mxu0  ;;  %v437_v30 = vsel %vm436_vm2, %v431_v26, -inf }
 0x215   : > { %438 = vmax.xlane.f32.xlu0 %v437_v30 }
 0x2a2   : > { %v439_v40 = vpop.xlane.xlu0 %438 }
 0x2a3   : > { %v440_v41 = vsub.f32 %v431_v26, %v439_v40 }
 0x2a5   : > { %v441_v42 = vmul.f32 1.442695, %v440_v41 }
 0x2a7   : > { %721 = vpow2.f32 %v441_v42 }
 0x2b1   : > { %v722_v43 = vpop.eup %721 }
 0x2b2   : > { %v443_v44 = vsel %vm436_vm2, %v722_v43, 0.0  ;;  %v446_v45 = vpack.c.bf16 %v722_v43, %v722_v43 }
 0x2b3   : > { %444 = vadd.xlane.f32.xlu0 %v443_v44 }
 0x2b4   : > { %648 = vmatmul.mubr.msk.bf16.vlgmr.msra.gmra.mrb[4].mxu1 %vm436_vm2, %v446_v45 }
 0x340   : > { %v445_v46 = vpop.xlane.xlu0 %444 }
 0x341   : > { %723 = vrcp.f32 %v445_v46 }
 0x34b   : > { %v724_v47 = vpop.eup %723 }
 0x387   : > { %v488_v48 = vpop.f32.mrb[4].mxu1 }
 0x388   : > { %v495_v49 = vmul.f32 %v724_v47, %v488_v48  ;;  %v649_v50 = vpop.f32.mrb[5].mxu1 }
 0x389   : > { %v491_v51 = vpop.f32.mrb[6].mxu1 }
 0x38a   : > { %496 = vst [vmem:[%s238_s6] sm:$0xff] %v495_v49  ;;  %v650_v52 = vpop.f32.mrb[7].mxu1 }
 0x38b   : > { %796 = shalt.err (!%p793_p9)
}
 0x38c   : > { %s797_s25 = scalar_lea.hbm %s1052_s8, 128  ;;  %s801_s28 = scalar_lea.hbm %s1100_s4, 256 }
 0x38d   : > { %p798_p2 = scmp.ne.s32.totalorder %s1052_s8, %s797_s25  ;;  %p802_p1 = scmp.lt.u32.totalorder %s1052_s8, %s1100_s4 }
 0x38e   : > { %p803_p11 = scmp.lt.u32.totalorder %s801_s28, %s797_s25  ;;  %p805_p6 = scmp.lt.u32.totalorder %s797_s25, %s1052_s8 }
 0x38f   : > { %p799_p5 = pnand %p798_p2, %p979_p12 }
 0x390   : > { %p804_p4 = por %p803_p11, %p802_p1 }
 0x391   : > { %p800_p0 = pneg %p799_p5 }
 0x392   : > { %p806_p8 = por %p805_p6, %p804_p4 }
 0x394   : > { %p807_p10 = pnand %p806_p8, %p800_p0 }
 0x396   : > { %810 = shalt.err (!%p807_p10)
}
 0x397   : > { %657 = dma.vmem_to_hbm [thread:$0]  (%p979_p12), %s1054_s5, 128, %s1052_s8, %s498_s19  }
 0x398 PF: > { %s523_s14 = sand.u32 1, %s841_s15   ;;  %p1115_p13 = scmp.ne.s32.totalorder %s1105_s22, 0 }
 0x399   : > { %p1116_p3 = scmp.ge.s32.totalorder %s853_s18, 2  ;;  %s524_s20 = scalar_lea.sflag [#allocation4], %s523_s14 }
 0x39b   : > { %p668_p7 = pnand %p1116_p3, %p1115_p13 }
 0x39d   : > { %836 = dma.done.wait (!%p668_p7), %s524_s20, 128  }
 0x39e   : > { %838 = vsyncadd (!%p668_p7), %s524_s20, 4294967168  ;;  %p18_p9 = scmp.ge.s32.totalorder %s944_s27, 4   ;;  %s1117_s15 = smov %s845_s16 }
 0x39f   : > { %s1118_s16 = smov %s849_s17  ;;  %s1119_s17 = smov %s975_s24 }
 0x3a0   : > { %s1120_s18 = smov %s944_s27  ;;  %20 = sbr.rel (!%p18_p9) target bundleno = 6 (0x6), region = 88 }
 0x3a7   :  { %529 = vsyncpa [#allocation3], 1 }
 0x3a8   :  { %531 = vsyncpa [#allocation3 + $0x1], 1 }
 0x3a9   :  { %532 = vsyncpa [#allocation6], 1 }
 0x3aa   :  { %533 = vsyncpa [#allocation4], 1 }
 0x3ab   :  { %535 = vsyncpa [#allocation4 + $0x1], 1 }

</bundles_post_ra>
